<compile_context>
chip_gen: v6e
topology: v6e:2x2x1
jax: 0.10.0
libtpu: 0.0.40
codegen_flags: <defaults>
</compile_context>

<pallas_src>
import math

import jax
import jax.numpy as jnp
from jax.experimental import pallas as pl
from jax.experimental.pallas import tpu as pltpu


def _make_dense_kernel(num_layers, activation):
    act = {"relu": lambda v: jnp.maximum(v, 0.0),
           "sigmoid": jax.nn.sigmoid}[activation]

    def kernel(x_ref, *refs):
        # refs = (w_0, b_0, w_1, b_1, ..., w_{L-1}, b_{L-1}, out_ref)
        out_ref = refs[-1]
        h = x_ref[...]                                  # (N, d0)
        for l in range(num_layers):
            w = refs[2 * l][...]                        # (d_l, d_{l+1})
            b = refs[2 * l + 1][...]                    # (1, d_{l+1})
            h = jnp.dot(h, w, preferred_element_type=jnp.float32) + b
            if l < num_layers - 1:                      # ReLU on hidden layers only
                h = act(h)
        out_ref[...] = h.astype(out_ref.dtype)          # (N, d_out)

    return kernel


def dense_model_forward(x, weights, biases, activation="relu"):
    """Fused DenseModel forward.

    x:       any shape; flattened to (N, input_dim) like x.view(-1, input_dim).
    weights: list of (M, d_l, d_{l+1}) float32 arrays (ModularLinear.weight).
    biases:  list of (M, 1, d_{l+1}) float32 arrays (ModularLinear.bias).
    returns: (M, N, output_dim) float32, matching torch broadcasting semantics.
    """
    num_layers = len(weights)
    M, d0, _ = weights[0].shape
    d_out = weights[-1].shape[-1]

    x2 = x.reshape(-1, d0).astype(jnp.float32)
    N = x2.shape[0]

    in_specs = [pl.BlockSpec((N, d0), lambda g: (0, 0))]  # constant block -> DMA'd once
    args = [x2]
    for l in range(num_layers):
        d_l, d_lp1 = weights[l].shape[1], weights[l].shape[2]
        in_specs.append(pl.BlockSpec((None, d_l, d_lp1), lambda g: (g, 0, 0)))
        in_specs.append(pl.BlockSpec((None, 1, d_lp1), lambda g: (g, 0, 0)))
        args.append(weights[l])
        args.append(biases[l])

    return pl.pallas_call(
        _make_dense_kernel(num_layers, activation),
        out_shape=jax.ShapeDtypeStruct((M, N, d_out), jnp.float32),
        grid_spec=pltpu.PrefetchScalarGridSpec(
            num_scalar_prefetch=0,
            grid=(M,),                                   # one step per module
            in_specs=in_specs,
            out_specs=pl.BlockSpec((None, N, d_out), lambda g: (g, 0, 0)),
        ),
        compiler_params=pltpu.CompilerParams(
            dimension_semantics=("parallel",)),          # megacore-splittable on v7x
    )(*args)


def _reference(x, weights, biases, activation="relu"):
    """Pure-JAX reference mirroring the PyTorch forward exactly."""
    act = {"relu": lambda v: jnp.maximum(v, 0.0),
           "sigmoid": jax.nn.sigmoid}[activation]
    h = x.reshape(-1, weights[0].shape[1])
    for l, (w, b) in enumerate(zip(weights, biases)):
        # torch.matmul broadcasting: (N,d) @ (M,d,k) -> (M,N,k); then batched.
        h = jnp.matmul(h, w, precision=jax.lax.Precision.HIGHEST) + b
        if l < len(weights) - 1:
            h = act(h)
    return h


if __name__ == "__main__":
    # DenseModel(input_dim=16, hidden_nodes=[32, 32], output_dim=8,
    #            num_modules=2, activation='relu'), batch of 16 samples.
    input_dim, hidden_nodes, output_dim = 16, [32, 32], 8
    num_modules, batch = 2, 16
    nodes = [input_dim] + hidden_nodes + [output_dim]

    key = jax.random.PRNGKey(0)
    key, kx = jax.random.split(key)
    x = jax.random.normal(kx, (batch, input_dim), dtype=jnp.float32)

    # ModularLinear.reset_parameters: uniform(-1/sqrt(in), 1/sqrt(in)).
    weights, biases = [], []
    for l in range(len(nodes) - 1):
        key, kw, kb = jax.random.split(key, 3)
        std = 1.0 / math.sqrt(nodes[l])
        weights.append(jax.random.uniform(
            kw, (num_modules, nodes[l], nodes[l + 1]),
            minval=-std, maxval=std, dtype=jnp.float32))
        biases.append(jax.random.uniform(
            kb, (num_modules, 1, nodes[l + 1]),
            minval=-std, maxval=std, dtype=jnp.float32))

    y = dense_model_forward(x, weights, biases, activation="relu")
    y = jax.block_until_ready(y)

    y_ref = _reference(x, weights, biases, activation="relu")
    assert y.shape == (num_modules, batch, output_dim), y.shape
    assert jnp.allclose(y, y_ref, atol=1e-4, rtol=1e-4), float(
        jnp.max(jnp.abs(y - y_ref)))

    # TODO(synk): logging.debug / debug_terminate side effects are no-ops for
    # the forward tensor and are intentionally not reproduced.
    print("KERNEL_OK")
</pallas_src>

<mosaic_0001>
module attributes {stable_mosaic.version = 11 : i64} {
  func.func @kernel(%arg0: i32, %arg1: memref<16x16xf32, #tpu.memory_space<vmem>>, %arg2: memref<1x16x32xf32, #tpu.memory_space<vmem>>, %arg3: memref<1x1x32xf32, #tpu.memory_space<vmem>>, %arg4: memref<1x32x32xf32, #tpu.memory_space<vmem>>, %arg5: memref<1x1x32xf32, #tpu.memory_space<vmem>>, %arg6: memref<1x32x8xf32, #tpu.memory_space<vmem>>, %arg7: memref<1x1x8xf32, #tpu.memory_space<vmem>>, %arg8: memref<1x16x8xf32, #tpu.memory_space<vmem>>) attributes {dimension_semantics = [#tpu.dimension_semantics<parallel>], iteration_bounds = array<i64: 2>, scalar_prefetch = 0 : i64, scratch_operands = 0 : i64, tpu.core_type = #tpu.core_type<tc>, window_params = [{pipeline_mode = #tpu.pipeline_mode<synchronous>, transform_indices = @transform_0, window_bounds = array<i64: 16, 16>}, {transform_indices = @transform_1, window_bounds = array<i64: 1, 16, 32>}, {transform_indices = @transform_2, window_bounds = array<i64: 1, 1, 32>}, {transform_indices = @transform_3, window_bounds = array<i64: 1, 32, 32>}, {transform_indices = @transform_4, window_bounds = array<i64: 1, 1, 32>}, {transform_indices = @transform_5, window_bounds = array<i64: 1, 32, 8>}, {transform_indices = @transform_6, window_bounds = array<i64: 1, 1, 8>}, {transform_indices = @transform_7, window_bounds = array<i64: 1, 16, 8>}]} {
    %c0 = arith.constant 0 : index
    %c0_0 = arith.constant 0 : index
    %0 = vector.load %arg1[%c0, %c0_0] : memref<16x16xf32, #tpu.memory_space<vmem>>, vector<16x16xf32>
    %c0_1 = arith.constant 0 : index
    %c0_2 = arith.constant 0 : index
    %c0_3 = arith.constant 0 : index
    %1 = vector.load %arg2[%c0_1, %c0_2, %c0_3] : memref<1x16x32xf32, #tpu.memory_space<vmem>>, vector<1x16x32xf32>
    %2 = vector.shape_cast %1 : vector<1x16x32xf32> to vector<16x32xf32>
    %c0_4 = arith.constant 0 : index
    %c0_5 = arith.constant 0 : index
    %c0_6 = arith.constant 0 : index
    %3 = vector.load %arg3[%c0_4, %c0_5, %c0_6] : memref<1x1x32xf32, #tpu.memory_space<vmem>>, vector<1x1x32xf32>
    %4 = vector.shape_cast %3 : vector<1x1x32xf32> to vector<1x32xf32>
    %cst = arith.constant dense<0.000000e+00> : vector<16x32xf32>
    %5 = tpu.matmul %0, %2, %cst {dimension_numbers = #tpu.dot_dimension_numbers<[1], [0], [0], [1], [0, 0, 1, 1], [], []>} : vector<16x16xf32>, vector<16x32xf32>, vector<16x32xf32> -> vector<16x32xf32>
    %6 = vector.broadcast %4 : vector<1x32xf32> to vector<16x32xf32>
    %7 = arith.addf %5, %6 : vector<16x32xf32>
    %cst_7 = arith.constant 0.000000e+00 : f32
    %8 = vector.broadcast %cst_7 : f32 to vector<16x32xf32>
    %9 = arith.maximumf %7, %8 : vector<16x32xf32>
    %c0_8 = arith.constant 0 : index
    %c0_9 = arith.constant 0 : index
    %c0_10 = arith.constant 0 : index
    %10 = vector.load %arg4[%c0_8, %c0_9, %c0_10] : memref<1x32x32xf32, #tpu.memory_space<vmem>>, vector<1x32x32xf32>
    %11 = vector.shape_cast %10 : vector<1x32x32xf32> to vector<32x32xf32>
    %c0_11 = arith.constant 0 : index
    %c0_12 = arith.constant 0 : index
    %c0_13 = arith.constant 0 : index
    %12 = vector.load %arg5[%c0_11, %c0_12, %c0_13] : memref<1x1x32xf32, #tpu.memory_space<vmem>>, vector<1x1x32xf32>
    %13 = vector.shape_cast %12 : vector<1x1x32xf32> to vector<1x32xf32>
    %cst_14 = arith.constant dense<0.000000e+00> : vector<16x32xf32>
    %14 = tpu.matmul %9, %11, %cst_14 {dimension_numbers = #tpu.dot_dimension_numbers<[1], [0], [0], [1], [0, 0, 1, 1], [], []>} : vector<16x32xf32>, vector<32x32xf32>, vector<16x32xf32> -> vector<16x32xf32>
    %15 = vector.broadcast %13 : vector<1x32xf32> to vector<16x32xf32>
    %16 = arith.addf %14, %15 : vector<16x32xf32>
    %cst_15 = arith.constant 0.000000e+00 : f32
    %17 = vector.broadcast %cst_15 : f32 to vector<16x32xf32>
    %18 = arith.maximumf %16, %17 : vector<16x32xf32>
    %c0_16 = arith.constant 0 : index
    %c0_17 = arith.constant 0 : index
    %c0_18 = arith.constant 0 : index
    %19 = vector.load %arg6[%c0_16, %c0_17, %c0_18] : memref<1x32x8xf32, #tpu.memory_space<vmem>>, vector<1x32x8xf32>
    %20 = vector.shape_cast %19 : vector<1x32x8xf32> to vector<32x8xf32>
    %c0_19 = arith.constant 0 : index
    %c0_20 = arith.constant 0 : index
    %c0_21 = arith.constant 0 : index
    %21 = vector.load %arg7[%c0_19, %c0_20, %c0_21] : memref<1x1x8xf32, #tpu.memory_space<vmem>>, vector<1x1x8xf32>
    %22 = vector.shape_cast %21 : vector<1x1x8xf32> to vector<1x8xf32>
    %cst_22 = arith.constant dense<0.000000e+00> : vector<16x8xf32>
    %23 = tpu.matmul %18, %20, %cst_22 {dimension_numbers = #tpu.dot_dimension_numbers<[1], [0], [0], [1], [0, 0, 1, 1], [], []>} : vector<16x32xf32>, vector<32x8xf32>, vector<16x8xf32> -> vector<16x8xf32>
    %24 = vector.broadcast %22 : vector<1x8xf32> to vector<16x8xf32>
    %25 = arith.addf %23, %24 : vector<16x8xf32>
    %c0_23 = arith.constant 0 : index
    %c0_24 = arith.constant 0 : index
    %c0_25 = arith.constant 0 : index
    %26 = vector.load %arg8[%c0_23, %c0_24, %c0_25] : memref<1x16x8xf32, #tpu.memory_space<vmem>>, vector<1x16x8xf32>
    %27 = vector.shape_cast %26 : vector<1x16x8xf32> to vector<16x8xf32>
    %28 = vector.shape_cast %25 : vector<16x8xf32> to vector<1x16x8xf32>
    tpu.vector_store %arg8[%c0_23, %c0_24, %c0_25], %28 {strides = array<i32>} : memref<1x16x8xf32, #tpu.memory_space<vmem>>, vector<1x16x8xf32>,
    return
  }
  func.func @transform_0(%arg0: i32) -> (i32, i32) {
    %c0_i32 = arith.constant 0 : i32
    %c0_i32_0 = arith.constant 0 : i32
    %c0_i32_1 = arith.constant 0 : i32
    return %c0_i32, %c0_i32_0 : i32, i32
  }
  func.func @transform_1(%arg0: i32) -> (i32, i32, i32) {
    %c0_i32 = arith.constant 0 : i32
    %c0_i32_0 = arith.constant 0 : i32
    %c0_i32_1 = arith.constant 0 : i32
    return %arg0, %c0_i32, %c0_i32_0 : i32, i32, i32
  }
  func.func @transform_2(%arg0: i32) -> (i32, i32, i32) {
    %c0_i32 = arith.constant 0 : i32
    %c0_i32_0 = arith.constant 0 : i32
    %c0_i32_1 = arith.constant 0 : i32
    return %arg0, %c0_i32, %c0_i32_0 : i32, i32, i32
  }
  func.func @transform_3(%arg0: i32) -> (i32, i32, i32) {
    %c0_i32 = arith.constant 0 : i32
    %c0_i32_0 = arith.constant 0 : i32
    %c0_i32_1 = arith.constant 0 : i32
    return %arg0, %c0_i32, %c0_i32_0 : i32, i32, i32
  }
  func.func @transform_4(%arg0: i32) -> (i32, i32, i32) {
    %c0_i32 = arith.constant 0 : i32
    %c0_i32_0 = arith.constant 0 : i32
    %c0_i32_1 = arith.constant 0 : i32
    return %arg0, %c0_i32, %c0_i32_0 : i32, i32, i32
  }
  func.func @transform_5(%arg0: i32) -> (i32, i32, i32) {
    %c0_i32 = arith.constant 0 : i32
    %c0_i32_0 = arith.constant 0 : i32
    %c0_i32_1 = arith.constant 0 : i32
    return %arg0, %c0_i32, %c0_i32_0 : i32, i32, i32
  }
  func.func @transform_6(%arg0: i32) -> (i32, i32, i32) {
    %c0_i32 = arith.constant 0 : i32
    %c0_i32_0 = arith.constant 0 : i32
    %c0_i32_1 = arith.constant 0 : i32
    return %arg0, %c0_i32, %c0_i32_0 : i32, i32, i32
  }
  func.func @transform_7(%arg0: i32) -> (i32, i32, i32) {
    %c0_i32 = arith.constant 0 : i32
    %c0_i32_0 = arith.constant 0 : i32
    %c0_i32_1 = arith.constant 0 : i32
    return %arg0, %c0_i32, %c0_i32_0 : i32, i32, i32
  }
}

</mosaic_0001>

<bundles_post_ra>
// kernel: tpu_custom_call.1
= control target key start
LH: loop header
LB: loop body
LE: loop exit
PB: predicated region body
PF: predicated region fallthrough
CT: control target
= control target key end

     0   :  { %12 = vsyncpa [#allocation3], 0  ;;  %s1139_s0 = inlined_call_operand.vmem [shape: f32[16,16], index: 0, kind: input, shape index: {}]   ;;  %s1140_s1 = inlined_call_operand.hbm [shape: f32[2,16,32], index: 1, kind: input, shape index: {}]   ;;  %s1141_s2 = inlined_call_operand.vmem [shape: f32[2,1,32], index: 2, kind: input, shape index: {}]   ;;  %s1142_s3 = inlined_call_operand.vmem [shape: f32[2,32,32], index: 3, kind: input, shape index: {}]   ;;  %s1143_s4 = inlined_call_operand.vmem [shape: f32[2,1,32], index: 4, kind: input, shape index: {}]   ;;  %s1144_s5 = inlined_call_operand.vmem [shape: f32[2,32,8], index: 5, kind: input, shape index: {}]   ;;  %s1145_s6 = inlined_call_operand.vmem [shape: f32[2,1,8], index: 6, kind: input, shape index: {}]   ;;  %s1146_s7 = inlined_call_operand.vmem [shape: f32[2,16,8], index: 7, kind: output, shape index: {}]  }
   0x1   :  { %14 = vsyncpa [#allocation3 + $0x1], 0  ;;  %s1006_s24 = smov 0   ;;  %s1008_s25 = smov 0  }
   0x2   :  { %s1010_s26 = smov 0   ;;  %s1012_s27 = smov 0  }
   0x3 LB: > { %s1025_s28 = sadd.s32 4294967295, %s961_s27   ;;  %s1028_s29 = sadd.s32 1, %s961_s27   ;;  %s961_s27 = sphi %s1012_s27, %s1155_s27   ;;  %s957_s26 = sphi %s1010_s26, %s1154_s26   ;;  %s953_s25 = sphi %s1008_s25, %s1153_s25   ;;  %s949_s24 = sphi %s1006_s24, %s1152_s24  }
   0x4   : > { %s45_s30 = ssub.s32 %s961_s27, %s1028_s29  ;;  %s48_s8 = sadd.s32 1, %s957_s26 }
   0x5   : > { %p46_p0 = scmp.eq.s32.totalorder %s45_s30, 0  ;;  %p55_p1 = scmp.ne.s32.totalorder %s957_s26, %s953_s25 }
   0x6   : > { %p56_p2 = scmp.eq.s32.totalorder %s961_s27, 0  ;;  %p61_p3 = scmp.ne.s32.totalorder %s953_s25, %s949_s24 }
   0x7   : > { %s1038_s9 = scalar_select %p46_p0, %s957_s26, %s48_s8  }
   0x8   : > { %p57_p4 = por %p56_p2, %p55_p1  ;;  %p62_p5 = scmp.eq.s32.totalorder %s1025_s28, 0 }
   0x9   : > { %p864_p6 = scmp.lt.s32.totalorder %s961_s27, 2  ;;  %s244_s11 = sand.u32 1, %s957_s26  }
   0xa   : > { %p1042_p7 = por %p62_p5, %p61_p3  ;;  %s787_s12 = sshll.u32 %s244_s11, 4 }
   0xb   : > { %s809_s13 = sshll.u32 %s961_s27, 8  ;;  %s248_s17 = scalar_lea.vmem [#allocation2], %s787_s12 }
   0xc   : > { %s1148_s10 = scalar_select %p1042_p7, 1, 0 }
   0xd   : > { %s1051_s16 = scalar_lea.hbm %s1140_s1, %s809_s13  ;;  %s255_s18 = sshll.u32 %s248_s17, 4  ;;  %s1053_s18 = int_to_ptr.vmem [resolvable:$true] %s255_s18 }
   0xe   : > { %p1055_p8 = pnand %p864_p6, %p57_p4  ;;  %s1060_s20 = scalar_lea.sflag [#allocation3], %s244_s11 }
   0xf   : > { %s899_s21 = scalar_lea.hbm %s1051_s16, 256  ;;  %s904_s24 = scalar_lea.hbm %s1140_s1, 512 }
  0x10   : > { %p900_p10 = scmp.ne.s32.totalorder %s1051_s16, %s899_s21  ;;  %p901_p11 = pneg %p1055_p8 }
  0x11   : > { %p905_p0 = scmp.lt.s32.totalorder %s1051_s16, %s1140_s1  ;;  %p906_p1 = scmp.lt.s32.totalorder %s904_s24, %s899_s21 }
  0x12   : > { %p902_p12 = pnand %p901_p11, %p900_p10 }
  0x13   : > { %p907_p2 = por %p906_p1, %p905_p0 }
  0x14   : > { %p903_p13 = pneg %p902_p12 }
  0x16   : > { %p908_p3 = pnand %p907_p2, %p903_p13 }
  0x18   : > { %911 = shalt.err (!%p908_p3)
}
  0x19   : > { %s912_s11 = scalar_lea.vmem %s1053_s18, 256  ;;  %s963_s12 = smov [#allocation2]  }
  0x1a   : > { %p913_p4 = scmp.ne.s32.totalorder %s1053_s18, %s912_s11  ;;  %s917_s13 = sshll.u32 %s963_s12, 4  ;;  %s918_s13 = int_to_ptr.vmem [resolvable:$false] %s917_s13 }
  0x1b   : > { %s919_s14 = scalar_lea.vmem %s918_s13, 512  ;;  %p920_p10 = scmp.lt.s32.totalorder %s1053_s18, %s918_s13 }
  0x1c   : > { %p915_p5 = pnand %p913_p4, %p901_p11  ;;  %p921_p12 = scmp.lt.s32.totalorder %s919_s14, %s912_s11 }
  0x1e   : > { %p916_p6 = pneg %p915_p5  ;;  %p922_p9 = por %p921_p12, %p920_p10 }
  0x20   : > { %p923_p7 = pnand %p922_p9, %p916_p6 }
  0x22   : > { %926 = shalt.err (!%p923_p7)
}
  0x23   : > { %s964_s15 = smov 128   ;;  %s965_s17 = smov 8  }
  0x24   : > { %863 = dma.hbm_to_vmem [thread:$0]  (!%p1055_p8), %s1051_s16, 256, %s1053_s18, %s1060_s20, %s964_s15, %s964_s15, %s965_s17  }
  0x25   : > { %p297_p11 = scmp.lt.s32.totalorder %s961_s27, 3  ;;  %p1150_p13 = scmp.ge.s32.totalorder %s961_s27, 1 }
  0x27   : > { %p298_p0 = pnand %p1150_p13, %p297_p11 }
  0x28   : > { %s303_s21 = sand.u32 (!%p298_p0), 1, %s953_s25   ;;  %p1151_p7 = scmp.ne.s32.totalorder (!%p298_p0), %s1148_s10, 0 }
  0x29   : > { %301 = sbr.rel (%p298_p0) target bundleno = 650 (0x28a), region = 48  ;;  %s791_s22 = sshll.u32 (!%p298_p0), %s303_s21, 4 }
  0x2a   : > { %s304_s23 = scalar_lea.sflag (!%p298_p0), [#allocation3], %s303_s21  ;;  %s307_s24 = scalar_lea.vmem (!%p298_p0), [#allocation2], %s791_s22 }
  0x2e   : > { %944 = dma.done.wait (%p1151_p7), %s304_s23, 256  }
  0x2f   : > { %946 = vsyncadd (%p1151_p7), %s304_s23, 4294967040  ;;  %vm392_vm0 = vcmask 130048   ;;  %v384_v0 = vld [vmem:[%s307_s24 + $0x8] sm:$0xff]  ;;  %v383_v1 = vld [vmem:[%s307_s24] sm:$0xff]  ;;  %p357_p8 = scmp.lt.s32.totalorder %s1025_s28, 1  ;;  %vm487_vm1 = vcmask 261120  }
  0x30   : > { %v381_v2 = vld [vmem:[%s1139_s0] sm:$0xff]  ;;  %829 = vmatprep.subr.mxu0 %v384_v0  ;;  %v382_v3 = vld [vmem:[%s1139_s0 + $0x8] sm:$0xff]  ;;  %vm663_vm2 = vcmask 64512  }
  0x31   : > { %833 = vmatprep.mubr.msk.f32.mxu0 %vm392_vm0, %v381_v2  ;;  %830 = vmatpush3.msra.mxu0 %v384_v0  ;;  %s1157_s28 = smov (!%p357_p8, %s1025_s28), 1 }
  0x32   : > { %831 = vmatprep.subr.mxu0 %v383_v1  ;;  %s810_s10 = sshll.u32 %s1157_s28, 5  ;;  %s359_s13 = scalar_lea.vmem %s1141_s2, %s1157_s28 }
  0x33   : > { %832 = vmatpush3.msra.mxu0 %v383_v1  ;;  %s364_s8 = scalar_lea.vmem %s1142_s3, %s810_s10  ;;  %v798_v8 = vld [vmem:[%s359_s13] ss:$0 sm:$0xff]  ;;  %s372_s17 = scalar_lea.vmem %s1144_s5, %s810_s10 }
  0x34   : > { %834 = vmatmul.mubr.msk.f32.vlgmr.msra.gmra.mxu0 %vm392_vm0, %v382_v3  ;;  %v479_v4 = vld [vmem:[%s364_s8 + $0x18] sm:$0xff]  ;;  %v478_v5 = vld [vmem:[%s364_s8 + $0x10] sm:$0xff]  ;;  %v477_v6 = vld [vmem:[%s364_s8 + $0x8] sm:$0xff]  ;;  %s367_s23 = scalar_lea.vmem %s1143_s4, %s1157_s28  ;;  %s375_s27 = scalar_lea.vmem %s1145_s6, %s1157_s28 }
  0x35   : > { %836 = vmatprep.subr.mxu1 %v479_v4  ;;  %v476_v7 = vld [vmem:[%s364_s8] sm:$0xff]  ;;  %v574_v15 = vld [vmem:[%s372_s17 + $0x18] sm:$0xff]  ;;  %v573_v16 = vld [vmem:[%s372_s17 + $0x10] sm:$0xff]  ;;  %s812_s18 = sshll.u32 %s1157_s28, 4 }
  0x36   : > { %837 = vmatpush3.msra.mxu1 %v479_v4  ;;  %847 = vmatprep.subr.mxu0 %v574_v15  ;;  %v572_v17 = vld [vmem:[%s372_s17 + $0x8] sm:$0xff]  ;;  %v571_v18 = vld [vmem:[%s372_s17] sm:$0xff]  ;;  %s380_s20 = scalar_lea.vmem %s1146_s7, %s812_s18 }
  0x37   : > { %838 = vmatprep.subr.mxu1 %v478_v5  ;;  %848 = vmatpush3.msra.mxu0 %v574_v15  ;;  %v801_v19 = vld [vmem:[%s367_s23] ss:$0 sm:$0xff] }
  0x38   : > { %839 = vmatpush3.msra.mxu1 %v478_v5  ;;  %849 = vmatprep.subr.mxu0 %v573_v16  ;;  %v804_v26 = vld [vmem:[%s375_s27] ss:$0 sm:$0xff] }
  0x39   : > { %840 = vmatprep.subr.mxu1 %v477_v6  ;;  %850 = vmatpush3.msra.mxu0 %v573_v16 }
  0x3a   : > { %841 = vmatpush3.msra.mxu1 %v477_v6  ;;  %851 = vmatprep.subr.mxu0 %v572_v17 }
  0x3b   : > { %842 = vmatprep.subr.mxu1 %v476_v7  ;;  %852 = vmatpush3.msra.mxu0 %v572_v17 }
  0x3c   : > { %843 = vmatpush3.msra.mxu1 %v476_v7  ;;  %853 = vmatprep.subr.mxu0 %v571_v18 }
  0x3d   : > { %854 = vmatpush3.msra.mxu0 %v571_v18 }
  0xf4   : > { %v835_v9 = vpop.f32.mrf.mxu0 }
  0xf5   : > { %v471_v10 = vadd.f32 %v835_v9, %v798_v8 }
  0xf6   : > { %v465_v11 = vpop.f32.mrf.mxu0 }
  0xf7   : > { %v466_v12 = vadd.f32 %v798_v8, %v465_v11  ;;  %v475_v14 = vmax.f32 %v471_v10, 0.0 }
  0xf9   : > { %v474_v13 = vmax.f32 %v466_v12, 0.0 }
  0xfb   : > { %844 = vmatprep.mubr.msk.f32.mxu1 %vm487_vm1, %v474_v13 }
  0xfc   : > { %845 = vmatmul.mubr.msk.f32.vlgmr.msra.gmra.mxu1 %vm487_vm1, %v475_v14 }
 0x1bc   : > { %v846_v20 = vpop.f32.mrf.mxu1 }
 0x1bd   : > { %v566_v21 = vadd.f32 %v846_v20, %v801_v19 }
 0x1be   : > { %v560_v22 = vpop.f32.mrf.mxu1 }
 0x1bf   : > { %v561_v23 = vadd.f32 %v801_v19, %v560_v22  ;;  %v570_v25 = vmax.f32 %v566_v21, 0.0 }
 0x1c1   : > { %v569_v24 = vmax.f32 %v561_v23, 0.0 }
 0x1c3   : > { %855 = vmatprep.mubr.msk.f32.mxu0 %vm487_vm1, %v569_v24 }
 0x1c4   : > { %856 = vmatmul.mubr.msk.f32.vlgmr.msra.gmra.mxu0 %vm487_vm1, %v570_v25 }
 0x284   : > { %v857_v27 = vpop.f32.mrf.mxu0 }
 0x285   : > { %v660_v28 = vadd.f32 %v857_v27, %v804_v26 }
 0x286   : > { %v654_v29 = vpop.f32.mrf.mxu0 }
 0x287   : > { %665 = vst.msk [vmem:[%s380_s20 + $0x8] sm:$0xff] %vm663_vm2, %v660_v28  ;;  %v655_v30 = vadd.f32 %v804_v26, %v654_v29 }
 0x289   : > { %664 = vst.msk [vmem:[%s380_s20] sm:$0xff] %vm663_vm2, %v655_v30 }
 0x28a PF: > { %p17_p9 = scmp.ge.s32.totalorder %s1028_s29, 4   ;;  %s1152_s24 = smov %s953_s25 }
 0x28b   : > { %s1153_s25 = smov %s957_s26  ;;  %s1154_s26 = smov %s1038_s9 }
 0x28c   : > { %s1155_s27 = smov %s1028_s29  ;;  %19 = sbr.rel (!%p17_p9) target bundleno = 3 (0x3), region = 103 }
 0x291   :  { %687 = vsyncpa [#allocation3], 1 }
 0x292   :  { %689 = vsyncpa [#allocation3 + $0x1], 1 }

</bundles_post_ra>
